<compile_context>
chip_gen: v6e
topology: v6e:2x2x1
jax: 0.10.0
libtpu: 0.0.40
codegen_flags: <defaults>
</compile_context>

<pallas_src>
import functools

import jax
import jax.numpy as jnp
from jax.experimental import pallas as pl
from jax.experimental.pallas import tpu as pltpu

DROPOUT1 = 0.2
DROPOUT2 = 0.5


def _round_up(x, m):
    return ((x + m - 1) // m) * m


def _hash_u32(x):
    """splitmix32-style finalizer: uint32 array -> well-mixed uint32 bits."""
    x = x ^ (x >> 16)
    x = x * jnp.uint32(0x7FEB352D)
    x = x ^ (x >> 15)
    x = x * jnp.uint32(0x846CA68B)
    x = x ^ (x >> 16)
    return x


def _dropout_in_kernel(h, p, seed_u32, row_start, salt):
    """mask = (bits >= p*2^32); return where(mask, h/(1-p), 0).  Pure VPU int/select ops."""
    assert 0.0 <= p <= 1.0
    if p == 0.0:
        return h
    if p == 1.0:
        return jnp.zeros_like(h)
    rows, cols = h.shape
    r = jax.lax.broadcasted_iota(jnp.int32, (rows, cols), 0) + row_start
    c = jax.lax.broadcasted_iota(jnp.int32, (rows, cols), 1)
    idx = (r * cols + c).astype(jnp.uint32)
    key = seed_u32 * jnp.uint32(0x9E3779B9) + jnp.uint32(salt)
    bits = _hash_u32(idx ^ key)
    thresh = jnp.uint32(min(int(round(p * 4294967296.0)), 4294967295))
    keep = bits >= thresh  # keep prob = 1 - p
    return jnp.where(keep, h * (1.0 / (1.0 - p)), jnp.zeros_like(h))


def mlp_kernel(seed_ref, x_ref, w1_ref, b1_ref, w2_ref, b2_ref, w3_ref, b3_ref,
               out_ref, *, tile_m, training):
    x = x_ref[...]  # bf16 (tile_m, num_inputs)

    if training:
        seed_u32 = seed_ref[0].astype(jnp.uint32)
        row_start = pl.program_id(0) * tile_m
    else:
        seed_u32 = None
        row_start = None

    # lin1 + ReLU (+ dropout1)
    h1 = jnp.dot(x, w1_ref[...], preferred_element_type=jnp.float32) + b1_ref[...]
    h1 = jnp.maximum(h1, 0.0)
    if training:
        h1 = _dropout_in_kernel(h1, DROPOUT1, seed_u32, row_start, salt=0x1)

    # lin2 + ReLU (+ dropout2)
    h2 = jnp.dot(h1.astype(w2_ref.dtype), w2_ref[...],
                 preferred_element_type=jnp.float32) + b2_ref[...]
    h2 = jnp.maximum(h2, 0.0)
    if training:
        h2 = _dropout_in_kernel(h2, DROPOUT2, seed_u32, row_start, salt=0x2)

    # lin3 (no activation), lane-dense (padded to 128 columns) store
    out_ref[...] = jnp.dot(h2.astype(w3_ref.dtype), w3_ref[...],
                           preferred_element_type=jnp.float32) + b3_ref[...]


def net_forward(x, params, seed, *, num_inputs, training=True, tile_m=1024):
    """Pallas implementation of Net.forward (X.reshape(-1, num_inputs) -> 3-layer MLP)."""
    w1, b1, w2, b2, w3, b3 = params
    num_hidden1 = w1.shape[1]
    num_hidden2 = w2.shape[1]
    num_outputs = w3.shape[1]

    x2d = x.reshape((-1, num_inputs)).astype(jnp.bfloat16)
    rows = x2d.shape[0]

    # Lane-dense output: pad the final layer to a multiple of 128 output columns.
    out_pad = _round_up(max(num_outputs, 1), 128)
    w3p = jnp.zeros((num_hidden2, out_pad), jnp.float32).at[:, :num_outputs].set(w3)
    b3p = jnp.zeros((1, out_pad), jnp.float32).at[:, :num_outputs].set(b3)

    # bf16 weights for the MXU (accumulation stays f32); biases stay f32.
    w1b = w1.astype(jnp.bfloat16)
    w2b = w2.astype(jnp.bfloat16)
    w3b = w3p.astype(jnp.bfloat16)

    # Row tiling: tile rows must be a multiple of 8; pad rows up to a tile multiple.
    tm = _round_up(min(tile_m, _round_up(rows, 8)), 8)
    rows_p = _round_up(rows, tm)
    if rows_p != rows:
        x2d = jnp.pad(x2d, ((0, rows_p - rows), (0, 0)))
    grid = (rows_p // tm,)

    seed_arr = jnp.asarray([seed], dtype=jnp.int32)
    kernel = functools.partial(mlp_kernel, tile_m=tm, training=training)

    flops = 2 * rows_p * (num_inputs * num_hidden1
                          + num_hidden1 * num_hidden2
                          + num_hidden2 * out_pad)
    bytes_accessed = (rows_p * num_inputs * 2          # bf16 activations in
                      + rows_p * out_pad * 4           # f32 output
                      + (w1b.size + w2b.size + w3b.size) * 2
                      + (b1.size + b2.size + b3p.size) * 4)

    out = pl.pallas_call(
        kernel,
        out_shape=jax.ShapeDtypeStruct((rows_p, out_pad), jnp.float32),
        grid_spec=pltpu.PrefetchScalarGridSpec(
            num_scalar_prefetch=1,          # seed lands in SMEM before the grid runs
            grid=grid,
            in_specs=[
                pl.BlockSpec((tm, num_inputs), lambda i, s: (i, 0)),   # x tile, pipelined
                pl.BlockSpec(w1b.shape, lambda i, s: (0, 0)),          # weights: resident
                pl.BlockSpec(b1.shape, lambda i, s: (0, 0)),
                pl.BlockSpec(w2b.shape, lambda i, s: (0, 0)),
                pl.BlockSpec(b2.shape, lambda i, s: (0, 0)),
                pl.BlockSpec(w3b.shape, lambda i, s: (0, 0)),
                pl.BlockSpec(b3p.shape, lambda i, s: (0, 0)),
            ],
            out_specs=pl.BlockSpec((tm, out_pad), lambda i, s: (i, 0)),
        ),
        compiler_params=pltpu.CompilerParams(
            dimension_semantics=("parallel",)),
        cost_estimate=pl.CostEstimate(flops=flops, transcendentals=0,
                                      bytes_accessed=bytes_accessed),
    )(seed_arr, x2d, w1b, b1, w2b, b2, w3b, b3p)

    return out[:rows, :num_outputs]


def init_params(key, num_inputs, num_hidden1, num_hidden2, num_outputs):
    """Deterministic PyTorch-Linear-style init: U(-1/sqrt(in), 1/sqrt(in)).

    Weights stored pre-transposed as (in_features, out_features); biases as (1, out)."""
    def linear(k, fan_in, fan_out):
        kw, kb = jax.random.split(k)
        bound = 1.0 / (fan_in ** 0.5)
        w = jax.random.uniform(kw, (fan_in, fan_out), jnp.float32, -bound, bound)
        b = jax.random.uniform(kb, (1, fan_out), jnp.float32, -bound, bound)
        return w, b

    k1, k2, k3 = jax.random.split(key, 3)
    w1, b1 = linear(k1, num_inputs, num_hidden1)
    w2, b2 = linear(k2, num_hidden1, num_hidden2)
    w3, b3 = linear(k3, num_hidden2, num_outputs)
    return (w1, b1, w2, b2, w3, b3)


def reference_forward_eval(x, params, num_inputs):
    """Plain-JAX reference for training=False, mirroring the kernel's bf16/f32 math."""
    w1, b1, w2, b2, w3, b3 = params
    x2d = x.reshape((-1, num_inputs)).astype(jnp.bfloat16)
    h1 = jnp.maximum(jnp.dot(x2d, w1.astype(jnp.bfloat16),
                             preferred_element_type=jnp.float32) + b1, 0.0)
    h2 = jnp.maximum(jnp.dot(h1.astype(jnp.bfloat16), w2.astype(jnp.bfloat16),
                             preferred_element_type=jnp.float32) + b2, 0.0)
    return jnp.dot(h2.astype(jnp.bfloat16), w3.astype(jnp.bfloat16),
                   preferred_element_type=jnp.float32) + b3


if __name__ == "__main__":
    # Small shapes consistent with the module: (B, C, H, W) = (2, 4, 16, 16)
    # flattens to (8, 256) rows of num_inputs=256.
    num_inputs, num_hidden1, num_hidden2, num_outputs = 256, 128, 64, 16

    key = jax.random.PRNGKey(0)
    kx, kp = jax.random.split(key)
    x = jax.random.normal(kx, (2, 4, 16, 16), dtype=jnp.float32)
    params = init_params(kp, num_inputs, num_hidden1, num_hidden2, num_outputs)

    # Eval-mode run (dropout off) — verified against a plain-JAX reference.
    out_eval = net_forward(x, params, seed=0, num_inputs=num_inputs, training=False)
    out_eval = jax.block_until_ready(out_eval)
    ref = reference_forward_eval(x, params, num_inputs)
    assert out_eval.shape == (8, num_outputs)
    assert jnp.allclose(out_eval, ref, atol=5e-3, rtol=5e-3)

    # Training-mode run (in-kernel counter-based dropout, integer-threshold select).
    out_train = net_forward(x, params, seed=42, num_inputs=num_inputs, training=True)
    out_train = jax.block_until_ready(out_train)
    assert out_train.shape == (8, num_outputs)
    assert bool(jnp.all(jnp.isfinite(out_train)))
    # Different seeds must give different dropout realizations.
    out_train2 = jax.block_until_ready(
        net_forward(x, params, seed=7, num_inputs=num_inputs, training=True))
    assert not jnp.allclose(out_train, out_train2)

    print("KERNEL_OK")
</pallas_src>

<mosaic_0001>
module attributes {stable_mosaic.version = 11 : i64} {
  func.func @mlp_kernel(%arg0: i32, %arg1: memref<1xi32, #tpu.memory_space<smem>>, %arg2: memref<8x256xbf16, #tpu.memory_space<vmem>>, %arg3: memref<256x128xbf16, #tpu.memory_space<vmem>>, %arg4: memref<1x128xf32, #tpu.memory_space<vmem>>, %arg5: memref<128x64xbf16, #tpu.memory_space<vmem>>, %arg6: memref<1x64xf32, #tpu.memory_space<vmem>>, %arg7: memref<64x128xbf16, #tpu.memory_space<vmem>>, %arg8: memref<1x128xf32, #tpu.memory_space<vmem>>, %arg9: memref<8x128xf32, #tpu.memory_space<vmem>>) attributes {dimension_semantics = [#tpu.dimension_semantics<parallel>], iteration_bounds = array<i64: 1>, scalar_prefetch = 1 : i64, scratch_operands = 0 : i64, tpu.core_type = #tpu.core_type<tc>, window_params = [{transform_indices = @transform_0, window_bounds = array<i64: 8, 256>}, {pipeline_mode = #tpu.pipeline_mode<synchronous>, transform_indices = @transform_1, window_bounds = array<i64: 256, 128>}, {pipeline_mode = #tpu.pipeline_mode<synchronous>, transform_indices = @transform_2, window_bounds = array<i64: 1, 128>}, {pipeline_mode = #tpu.pipeline_mode<synchronous>, transform_indices = @transform_3, window_bounds = array<i64: 128, 64>}, {pipeline_mode = #tpu.pipeline_mode<synchronous>, transform_indices = @transform_4, window_bounds = array<i64: 1, 64>}, {pipeline_mode = #tpu.pipeline_mode<synchronous>, transform_indices = @transform_5, window_bounds = array<i64: 64, 128>}, {pipeline_mode = #tpu.pipeline_mode<synchronous>, transform_indices = @transform_6, window_bounds = array<i64: 1, 128>}, {transform_indices = @transform_7, window_bounds = array<i64: 8, 128>}]} {
    %c0 = arith.constant 0 : index
    %c0_0 = arith.constant 0 : index
    %0 = vector.load %arg2[%c0, %c0_0] : memref<8x256xbf16, #tpu.memory_space<vmem>>, vector<8x256xbf16>
    %c0_1 = arith.constant 0 : index
    %c0_2 = arith.constant 0 : index
    %1 = vector.load %arg3[%c0_1, %c0_2] : memref<256x128xbf16, #tpu.memory_space<vmem>>, vector<256x128xbf16>
    %cst = arith.constant dense<0.000000e+00> : vector<8x128xf32>
    %2 = tpu.matmul %0, %1, %cst {dimension_numbers = #tpu.dot_dimension_numbers<[1], [0], [0], [1], [0, 0, 1, 1], [], []>} : vector<8x256xbf16>, vector<256x128xbf16>, vector<8x128xf32> -> vector<8x128xf32>
    %c0_3 = arith.constant 0 : index
    %c0_4 = arith.constant 0 : index
    %3 = vector.load %arg4[%c0_3, %c0_4] : memref<1x128xf32, #tpu.memory_space<vmem>>, vector<1x128xf32>
    %4 = vector.broadcast %3 : vector<1x128xf32> to vector<8x128xf32>
    %5 = arith.addf %2, %4 : vector<8x128xf32>
    %cst_5 = arith.constant 0.000000e+00 : f32
    %6 = vector.broadcast %cst_5 : f32 to vector<8x128xf32>
    %7 = arith.maximumf %5, %6 : vector<8x128xf32>
    %8 = arith.truncf %7 : vector<8x128xf32> to vector<8x128xbf16>
    %c0_6 = arith.constant 0 : index
    %c0_7 = arith.constant 0 : index
    %9 = vector.load %arg5[%c0_6, %c0_7] : memref<128x64xbf16, #tpu.memory_space<vmem>>, vector<128x64xbf16>
    %cst_8 = arith.constant dense<0.000000e+00> : vector<8x64xf32>
    %10 = tpu.matmul %8, %9, %cst_8 {dimension_numbers = #tpu.dot_dimension_numbers<[1], [0], [0], [1], [0, 0, 1, 1], [], []>} : vector<8x128xbf16>, vector<128x64xbf16>, vector<8x64xf32> -> vector<8x64xf32>
    %c0_9 = arith.constant 0 : index
    %c0_10 = arith.constant 0 : index
    %11 = vector.load %arg6[%c0_9, %c0_10] : memref<1x64xf32, #tpu.memory_space<vmem>>, vector<1x64xf32>
    %12 = vector.broadcast %11 : vector<1x64xf32> to vector<8x64xf32>
    %13 = arith.addf %10, %12 : vector<8x64xf32>
    %cst_11 = arith.constant 0.000000e+00 : f32
    %14 = vector.broadcast %cst_11 : f32 to vector<8x64xf32>
    %15 = arith.maximumf %13, %14 : vector<8x64xf32>
    %16 = arith.truncf %15 : vector<8x64xf32> to vector<8x64xbf16>
    %c0_12 = arith.constant 0 : index
    %c0_13 = arith.constant 0 : index
    %17 = vector.load %arg7[%c0_12, %c0_13] : memref<64x128xbf16, #tpu.memory_space<vmem>>, vector<64x128xbf16>
    %cst_14 = arith.constant dense<0.000000e+00> : vector<8x128xf32>
    %18 = tpu.matmul %16, %17, %cst_14 {dimension_numbers = #tpu.dot_dimension_numbers<[1], [0], [0], [1], [0, 0, 1, 1], [], []>} : vector<8x64xbf16>, vector<64x128xbf16>, vector<8x128xf32> -> vector<8x128xf32>
    %c0_15 = arith.constant 0 : index
    %c0_16 = arith.constant 0 : index
    %19 = vector.load %arg8[%c0_15, %c0_16] : memref<1x128xf32, #tpu.memory_space<vmem>>, vector<1x128xf32>
    %20 = vector.broadcast %19 : vector<1x128xf32> to vector<8x128xf32>
    %21 = arith.addf %18, %20 : vector<8x128xf32>
    %c0_17 = arith.constant 0 : index
    %c0_18 = arith.constant 0 : index
    %22 = vector.load %arg9[%c0_17, %c0_18] : memref<8x128xf32, #tpu.memory_space<vmem>>, vector<8x128xf32>
    tpu.vector_store %arg9[%c0_17, %c0_18], %21 {strides = array<i32>} : memref<8x128xf32, #tpu.memory_space<vmem>>, vector<8x128xf32>,
    return
  }
  func.func @transform_0(%arg0: i32, %arg1: memref<1xi32, #tpu.memory_space<smem>>) -> (i32, i32) {
    %c0_i32 = arith.constant 0 : i32
    %c0_i32_0 = arith.constant 0 : i32
    return %arg0, %c0_i32 : i32, i32
  }
  func.func @transform_1(%arg0: i32, %arg1: memref<1xi32, #tpu.memory_space<smem>>) -> (i32, i32) {
    %c0_i32 = arith.constant 0 : i32
    %c0_i32_0 = arith.constant 0 : i32
    %c0_i32_1 = arith.constant 0 : i32
    return %c0_i32, %c0_i32_0 : i32, i32
  }
  func.func @transform_2(%arg0: i32, %arg1: memref<1xi32, #tpu.memory_space<smem>>) -> (i32, i32) {
    %c0_i32 = arith.constant 0 : i32
    %c0_i32_0 = arith.constant 0 : i32
    %c0_i32_1 = arith.constant 0 : i32
    return %c0_i32, %c0_i32_0 : i32, i32
  }
  func.func @transform_3(%arg0: i32, %arg1: memref<1xi32, #tpu.memory_space<smem>>) -> (i32, i32) {
    %c0_i32 = arith.constant 0 : i32
    %c0_i32_0 = arith.constant 0 : i32
    %c0_i32_1 = arith.constant 0 : i32
    return %c0_i32, %c0_i32_0 : i32, i32
  }
  func.func @transform_4(%arg0: i32, %arg1: memref<1xi32, #tpu.memory_space<smem>>) -> (i32, i32) {
    %c0_i32 = arith.constant 0 : i32
    %c0_i32_0 = arith.constant 0 : i32
    %c0_i32_1 = arith.constant 0 : i32
    return %c0_i32, %c0_i32_0 : i32, i32
  }
  func.func @transform_5(%arg0: i32, %arg1: memref<1xi32, #tpu.memory_space<smem>>) -> (i32, i32) {
    %c0_i32 = arith.constant 0 : i32
    %c0_i32_0 = arith.constant 0 : i32
    %c0_i32_1 = arith.constant 0 : i32
    return %c0_i32, %c0_i32_0 : i32, i32
  }
  func.func @transform_6(%arg0: i32, %arg1: memref<1xi32, #tpu.memory_space<smem>>) -> (i32, i32) {
    %c0_i32 = arith.constant 0 : i32
    %c0_i32_0 = arith.constant 0 : i32
    %c0_i32_1 = arith.constant 0 : i32
    return %c0_i32, %c0_i32_0 : i32, i32
  }
  func.func @transform_7(%arg0: i32, %arg1: memref<1xi32, #tpu.memory_space<smem>>) -> (i32, i32) {
    %c0_i32 = arith.constant 0 : i32
    %c0_i32_0 = arith.constant 0 : i32
    return %arg0, %c0_i32 : i32, i32
  }
}

</mosaic_0001>

<bundles_post_ra>
// kernel: tpu_custom_call.1
= control target key start
LH: loop header
LB: loop body
LE: loop exit
PB: predicated region body
PF: predicated region fallthrough
CT: control target
= control target key end

     0   :  { %14 = vsyncpa [#allocation5], 0  ;;  %s742_s0 = inlined_call_operand.<no memory space> [shape: s32[1], index: 0, kind: input, shape index: {}]   ;;  %s743_s1 = inlined_call_operand.vmem [shape: bf16[8,256], index: 1, kind: input, shape index: {}]   ;;  %s744_s2 = inlined_call_operand.hbm [shape: bf16[256,128], index: 2, kind: input, shape index: {}]   ;;  %s745_s3 = inlined_call_operand.vmem [shape: f32[1,128], index: 3, kind: input, shape index: {}]   ;;  %s746_s4 = inlined_call_operand.vmem [shape: bf16[128,64], index: 4, kind: input, shape index: {}]   ;;  %s747_s5 = inlined_call_operand.vmem [shape: f32[1,64], index: 5, kind: input, shape index: {}]   ;;  %s748_s6 = inlined_call_operand.vmem [shape: bf16[64,128], index: 6, kind: input, shape index: {}]   ;;  %s749_s7 = inlined_call_operand.vmem [shape: f32[1,128], index: 7, kind: input, shape index: {}]   ;;  %s750_s8 = inlined_call_operand.hbm [shape: f32[8,128], index: 8, kind: output, shape index: {}]  }
   0x1   :  { %15 = vsyncpa [#allocation6], 0  ;;  %s623_s26 = smov [#allocation4]  }
   0x2   :  { %s23_s27 = sshll.u32 %s623_s26, 4  ;;  %s24_s27 = int_to_ptr.vmem [resolvable:$true] %s23_s27 }
   0x3   :  { %s587_s28 = scalar_lea.vmem %s24_s27, 2048  ;;  %p592_p1 = scmp.lt.s32.totalorder %s24_s27, %s24_s27 }
   0x4   :  { %p588_p0 = scmp.ne.s32.totalorder %s24_s27, %s587_s28  ;;  %p593_p2 = scmp.lt.s32.totalorder %s587_s28, %s587_s28 }
   0x6   :  { %p594_p3 = por %p593_p2, %p592_p1 }
   0x8   :  { %p595_p4 = pnand %p594_p3, %p588_p0 }
   0xa   :  { %598 = shalt.err (!%p595_p4)
}
   0xb   :  { %s624_s29 = smov 64   ;;  %s625_s30 = smov 4  }
   0xc   :  { %29 = dma.hbm_to_vmem [thread:$0]  %s744_s2, 2048, %s24_s27, [#allocation5], %s624_s29, %s624_s29, %s625_s30  }
   0xd   :  { %619 = dma.done.wait [#allocation5], 2048  }
   0xe   :  { %620 = vsyncadd [#allocation5], 4294965248  ;;  %v626_v0 = vmov 0.0   ;;  %v549_v1 = vld [vmem:[#allocation4 + $0x78] sm:$0xff]   ;;  %v551_v3 = vld [vmem:[#allocation4 + $0x70] sm:$0xff]   ;;  %vm627_vm0 = vmmov 0  }
   0xf   :  { %511 = vmatprep.subr.bf16.mxu1 %v626_v0  ;;  %v550_v2 = vld [vmem:[#allocation4 + $0x38] sm:$0xff]   ;;  %475 = vmatprep.subr.bf16.mxu0 %v549_v1  ;;  %v552_v4 = vld [vmem:[#allocation4 + $0x30] sm:$0xff]   ;;  %v553_v5 = vld [vmem:[#allocation4 + $0x68] sm:$0xff]   ;;  %vm381_vm1 = vcmask 523264   ;;  %s628_s15 = smov [#allocation7]  }
  0x10   :  { %476 = vmatpush3.bf16.msra.mxu0 %v550_v2  ;;  %v554_v6 = vld [vmem:[#allocation4 + $0x28] sm:$0xff]   ;;  %v555_v7 = vld [vmem:[#allocation4 + $0x60] sm:$0xff]   ;;  %v557_v9 = vld [vmem:[#allocation4 + $0x58] sm:$0xff]   ;;  %527 = vmatprep.mubr.msk.bf16.mxu1 %vm627_vm0, %v626_v0 }
  0x11   :  { %477 = vmatprep.subr.bf16.mxu0 %v551_v3  ;;  %v556_v8 = vld [vmem:[#allocation4 + $0x20] sm:$0xff]   ;;  %v558_v10 = vld [vmem:[#allocation4 + $0x18] sm:$0xff]   ;;  %v559_v11 = vld [vmem:[#allocation4 + $0x50] sm:$0xff]  }
  0x12   :  { %v44_v12 = vld [vmem:[%s743_s1] sm:$0xff]  ;;  %v567_v14 = vld [vmem:[%s746_s4 + $0x38] sm:$0xff]   ;;  %v560_v15 = vld [vmem:[#allocation4 + $0x10] sm:$0xff]  }
  0x13   :  { %v443_v13 = vcombine.high %v44_v12, %v44_v12  ;;  %v561_v16 = vld [vmem:[#allocation4 + $0x48] sm:$0xff]   ;;  %512 = vmatpush3.bf16.msra.mxu1 %v567_v14  ;;  %v568_v17 = vld [vmem:[%s746_s4 + $0x30] sm:$0xff]   ;;  %v563_v19 = vld [vmem:[#allocation4 + $0x40] sm:$0xff]   ;;  %v442_v23 = vcombine.low %v44_v12, %v44_v12 }
  0x14   :  { %478 = vmatpush3.bf16.msra.mxu0 %v552_v4  ;;  %v562_v18 = vld [vmem:[#allocation4 + $0x8] sm:$0xff]   ;;  %513 = vmatprep.subr.bf16.mxu1 %v626_v0  ;;  %v564_v21 = vld [vmem:[#allocation4] sm:$0xff]   ;;  %v571_v24 = vld [vmem:[%s746_s4 + $0x18] sm:$0xff]  }
  0x15   :  { %479 = vmatprep.subr.bf16.mxu0 %v553_v5  ;;  %219 = vmatprep.mubr.bf16.mxu0 %v443_v13  ;;  %v569_v20 = vld [vmem:[%s746_s4 + $0x28] sm:$0xff]   ;;  %v570_v22 = vld [vmem:[%s746_s4 + $0x20] sm:$0xff]   ;;  %v572_v25 = vld [vmem:[%s746_s4 + $0x10] sm:$0xff]  }
  0x16   :  { %v573_v26 = vld [vmem:[%s746_s4 + $0x8] sm:$0xff]   ;;  %v574_v27 = vld [vmem:[%s746_s4] sm:$0xff]   ;;  %v575_v28 = vld [vmem:[%s748_s6 + $0x18] sm:$0xff]  }
  0x17   :  { %514 = vmatpush3.bf16.msra.mxu1 %v568_v17  ;;  %v576_v29 = vld [vmem:[%s748_s6 + $0x10] sm:$0xff]   ;;  %v441_v31 = vld [vmem:[%s745_s3] ss:$0 sm:$0xff]  ;;  %v577_v39 = vld [vmem:[%s748_s6 + $0x8] sm:$0xff]  }
  0x18   :  { %480 = vmatpush3.bf16.msra.mxu0 %v554_v6  ;;  %515 = vmatprep.subr.bf16.mxu1 %v626_v0  ;;  %v578_v40 = vld [vmem:[%s748_s6] sm:$0xff]   ;;  %s432_s6 = sshll.u32 %s628_s15, 4  ;;  %s433_s6 = int_to_ptr.vmem [resolvable:$true] %s432_s6 }
  0x19   :  { %481 = vmatprep.subr.bf16.mxu0 %v555_v7  ;;  %v460_v41 = vld [vmem:[%s747_s5] ss:$0 sm:$0xff]  ;;  %s599_s5 = scalar_lea.vmem %s433_s6, 128  ;;  %p604_p6 = scmp.lt.s32.totalorder %s433_s6, %s433_s6 }
  0x1a   :  { %v469_v49 = vld [vmem:[%s749_s7] ss:$0 sm:$0xff]  ;;  %p600_p5 = scmp.ne.s32.totalorder %s433_s6, %s599_s5  ;;  %p605_p7 = scmp.lt.s32.totalorder %s599_s5, %s599_s5 }
  0x1b   :  { %516 = vmatpush3.bf16.msra.mxu1 %v569_v20 }
  0x1c   :  { %482 = vmatpush3.bf16.msra.mxu0 %v556_v8  ;;  %517 = vmatprep.subr.bf16.mxu1 %v626_v0  ;;  %p606_p8 = por %p605_p7, %p604_p6 }
  0x1d   :  { %483 = vmatprep.subr.bf16.mxu0 %v557_v9 }
  0x1e   :  { %p607_p9 = pnand %p606_p8, %p600_p5 }
  0x1f   :  { %518 = vmatpush3.bf16.msra.mxu1 %v570_v22 }
  0x20   :  { %484 = vmatpush3.bf16.msra.mxu0 %v558_v10  ;;  %519 = vmatprep.subr.bf16.mxu1 %v626_v0 }
  0x21   :  { %485 = vmatprep.subr.bf16.mxu0 %v559_v11 }
  0x23   :  { %520 = vmatpush3.bf16.msra.mxu1 %v571_v24 }
  0x24   :  { %486 = vmatpush3.bf16.msra.mxu0 %v560_v15  ;;  %521 = vmatprep.subr.bf16.mxu1 %v626_v0 }
  0x25   :  { %487 = vmatprep.subr.bf16.mxu0 %v561_v16 }
  0x27   :  { %522 = vmatpush3.bf16.msra.mxu1 %v572_v25 }
  0x28   :  { %488 = vmatpush3.bf16.msra.mxu0 %v562_v18  ;;  %523 = vmatprep.subr.bf16.mxu1 %v626_v0 }
  0x29   :  { %489 = vmatprep.subr.bf16.mxu0 %v563_v19 }
  0x2b   :  { %524 = vmatpush3.bf16.msra.mxu1 %v573_v26 }
  0x2c   :  { %490 = vmatpush3.bf16.msra.mxu0 %v564_v21  ;;  %525 = vmatprep.subr.bf16.mxu1 %v626_v0 }
  0x2d   :  { %531 = vmatprep.subr.bf16.mxu0 %v626_v0 }
  0x2f   :  { %220 = vmatmul.mubr.bf16.vlgmr.msra.gmra.mxu0 %v442_v23  ;;  %526 = vmatpush3.bf16.msra.mxu1 %v574_v27 }
  0x30   :  { %539 = vmatprep.mubr.msk.bf16.mxu0 %vm627_vm0, %v626_v0  ;;  %532 = vmatpush3.bf16.msra.mxu0 %v575_v28 }
  0x31   :  { %533 = vmatprep.subr.bf16.mxu0 %v626_v0 }
  0x34   :  { %534 = vmatpush3.bf16.msra.mxu0 %v576_v29 }
  0x35   :  { %535 = vmatprep.subr.bf16.mxu0 %v626_v0 }
  0x38   :  { %536 = vmatpush3.bf16.msra.mxu0 %v577_v39 }
  0x39   :  { %537 = vmatprep.subr.bf16.mxu0 %v626_v0 }
  0x3c   :  { %538 = vmatpush3.bf16.msra.mxu0 %v578_v40 }
  0xef   :  { %v491_v30 = vpop.f32.mrf.mxu0 }
  0xf1   :  { %v492_v32 = vpop.f32.mrf.mxu0 }
  0xf2   :  { %v493_v33 = vadd.f32 %v492_v32, %v491_v30 }
  0xf3   :  { %v494_v34 = vpop.f32.mrf.mxu0 }
  0xf4   :  { %v222_v35 = vadd.f32 %v493_v33, %v441_v31 }
  0xf5   :  { %v495_v36 = vpop.f32.mrf.mxu0 }
  0xf6   :  { %v227_v37 = vmax.f32 %v222_v35, 0.0 }
  0xf8   :  { %v228_v38 = vpack.c.bf16 %v227_v37, %v227_v37 }
  0xfa   :  { %528 = vmatmul.mubr.bf16.vlgmr.msra.gmra.mxu1 %v228_v38 }
 0x1ba   :  { %v334_v42 = vpop.f32.mrf.mxu1 }
 0x1bb   :  { %v335_v43 = vadd.f32 %v460_v41, %v334_v42 }
 0x1bc   :  { %v529_v44 = vpop.f32.mrf.mxu1 }
 0x1bd   :  { %v340_v45 = vmax.f32 %v335_v43, 0.0 }
 0x1be   :  { %v337_v46 = vpop.f32.mrf.mxu1 }
 0x1bf   :  { %v341_v47 = vpack.c.bf16 %v340_v45, %v340_v45 }
 0x1c0   :  { %v530_v48 = vpop.f32.mrf.mxu1 }
 0x1c1   :  { %540 = vmatmul.mubr.msk.bf16.vlgmr.msra.gmra.mxu0 %vm381_vm1, %v341_v47 }
 0x281   :  { %v419_v50 = vpop.f32.mrf.mxu0 }
 0x282   :  { %v420_v51 = vadd.f32 %v469_v49, %v419_v50 }
 0x283   :  { %v541_v52 = vpop.f32.mrf.mxu0 }
 0x284   :  { %425 = vst [vmem:[#allocation7] sm:$0xff] %v420_v51 }
 0x285   :  { %v422_v53 = vpop.f32.mrf.mxu0 }
 0x286   :  { %610 = shalt.err (!%p607_p9)
}
 0x287   :  { %435 = dma.vmem_to_hbm [thread:$0]  %s433_s6, 128, %s750_s8, [#allocation6]   ;;  %v542_v54 = vpop.f32.mrf.mxu0 }
 0x288   :  { %621 = dma.done.wait [#allocation6], 128  }
 0x289   :  { %622 = vsyncadd [#allocation6], 4294967168 }
 0x28a   :  { %439 = vsyncpa [#allocation5], 1 }
 0x28b   :  { %440 = vsyncpa [#allocation6], 1 }

</bundles_post_ra>
